<compile_context>
chip_gen: v7x
topology: tpu7x:2x2x1
jax: 0.10.0
libtpu: 0.0.40
codegen_flags: <defaults>
</compile_context>

<pallas_src>
import jax
import jax.numpy as jnp
from jax import lax
from jax.experimental import pallas as pl
from jax.experimental.pallas import tpu as pltpu


def _round_up(x, m):
    return (x + m - 1) // m * m


def _pad2d(a, rows, cols):
    out = jnp.zeros((rows, cols), a.dtype)
    return out.at[: a.shape[0], : a.shape[1]].set(a)


# ---------------------------------------------------------------------------
# Kernel 1: input-side GRU projection for ALL timesteps at once.
#   xin = x_emb @ [W_ir|W_iz|W_in] + [b_ir|b_iz|b_in]
#   (relu is already baked into the embedding table).
# ---------------------------------------------------------------------------
def _input_proj_kernel(x_ref, w_ref, b_ref, o_ref):
    o_ref[...] = (jnp.dot(x_ref[...], w_ref[...],
                          preferred_element_type=jnp.float32) + b_ref[...])


# ---------------------------------------------------------------------------
# Kernel 2: the sequential GRU recurrence.  One grid step = TB timesteps.
#   Only the hidden-side matmul (bsp,Hp)@(Hp,3Hp) sits on the critical path.
#   h is carried across grid steps in a small VMEM scratch; every h_t is
#   written out for the hoisted output projection.
# ---------------------------------------------------------------------------
def _gru_steps_kernel(xin_ref, h0_ref, wh_ref, bh_ref, hseq_ref, h_carry):
    TB = xin_ref.shape[0]
    Hp = h0_ref.shape[1]

    @pl.when(pl.program_id(0) == 0)
    def _():
        h_carry[...] = h0_ref[...]

    wh = wh_ref[...]                      # (Hp, 3Hp) bf16, VMEM-resident
    bh = bh_ref[...]                      # (1, 3Hp)  f32

    def step(tb, h):
        gi = xin_ref[tb]                  # (bsp, 3Hp) f32, precomputed
        gh = jnp.dot(h.astype(jnp.bfloat16), wh,
                     preferred_element_type=jnp.float32) + bh
        r = jax.nn.sigmoid(gi[:, 0:Hp] + gh[:, 0:Hp])
        z = jax.nn.sigmoid(gi[:, Hp:2 * Hp] + gh[:, Hp:2 * Hp])
        n = jnp.tanh(gi[:, 2 * Hp:3 * Hp] + r * gh[:, 2 * Hp:3 * Hp])
        h_new = (1.0 - z) * n + z * h
        hseq_ref[tb] = h_new
        return h_new

    h_carry[...] = lax.fori_loop(0, TB, step, h_carry[...], unroll=True)


# ---------------------------------------------------------------------------
# Kernel 3: output projection with online log-sum-exp, tiled over V.
#   Writes unnormalized logits, and per-row lse on the last V tile.
# ---------------------------------------------------------------------------
def _output_proj_kernel(h_ref, w_ref, b_ref, logits_ref, lse_ref, m_sc, l_sc):
    j = pl.program_id(1)

    @pl.when(j == 0)
    def _():
        m_sc[...] = jnp.full(m_sc.shape, -jnp.inf, jnp.float32)
        l_sc[...] = jnp.zeros(l_sc.shape, jnp.float32)

    # Padded vocab columns carry a -1e30 bias (finite), so logits stay finite.
    logits = (jnp.dot(h_ref[...], w_ref[...],
                      preferred_element_type=jnp.float32) + b_ref[...])
    m_prev = m_sc[...]
    m_new = jnp.maximum(m_prev, jnp.max(logits, axis=1, keepdims=True))
    alpha = jnp.exp(m_prev - m_new)
    l_sc[...] = alpha * l_sc[...] + jnp.sum(jnp.exp(logits - m_new),
                                            axis=1, keepdims=True)
    m_sc[...] = m_new
    logits_ref[...] = logits

    @pl.when(j == pl.num_programs(1) - 1)
    def _():
        lse_ref[...] = m_sc[...] + jnp.log(l_sc[...])


# Kernel 4: logp = logits - lse (per-row broadcast).
def _normalize_kernel(logits_ref, lse_ref, logp_ref):
    logp_ref[...] = logits_ref[...] - lse_ref[...]


# ---------------------------------------------------------------------------
# Parameter preparation: lane-dense padding, gate fusion, bf16 weight casts.
# ---------------------------------------------------------------------------
def prepare_decoder_params(params, hidden_size, output_size, emb_dim=300):
    H, E, V = hidden_size, emb_dim, output_size
    Hp = _round_up(H, 128)
    Ep = _round_up(E, 128)
    # V tiles 512-wide (multiple of 256 for the v6e/v7x MXUs); small vocabs
    # use a single 128-multiple tile.
    if V <= 512:
        Vp, tv = _round_up(V, 128), _round_up(V, 128)
    else:
        Vp, tv = _round_up(V, 512), 512

    w_ih, w_hh = params["w_ih"], params["w_hh"]      # (3H, E), (3H, H)
    b_ih, b_hh = params["b_ih"], params["b_hh"]

    def fuse_gates(w, b, rows, rows_p):
        """(3H, rows) weight + (3H,) bias -> (rows_p, 3Hp) [r|z|n] blocks."""
        wf = jnp.zeros((rows_p, 3 * Hp), jnp.float32)
        bf = jnp.zeros((1, 3 * Hp), jnp.float32)
        for g in range(3):
            wf = wf.at[:rows, g * Hp:g * Hp + H].set(w[g * H:(g + 1) * H].T)
            bf = bf.at[0, g * Hp:g * Hp + H].set(b[g * H:(g + 1) * H])
        return wf.astype(jnp.bfloat16), bf

    w_if, b_if = fuse_gates(w_ih, b_ih, E, Ep)       # input-side gates
    w_h, b_h = fuse_gates(w_hh, b_hh, H, Hp)         # hidden-side gates

    w_out = _pad2d(params["w_out"].T, Hp, Vp).astype(jnp.bfloat16)   # (Hp, Vp)
    # Vocab-padding mask baked into the bias: padded cols -> -1e30 (finite).
    b_out = jnp.full((1, Vp), -1e30, jnp.float32).at[0, :V].set(params["b_out"])

    # relu commutes with the row gather -> bake it into the embedding table.
    emb_relu = _pad2d(jnp.maximum(params["embedding"], 0.0), V, Ep)
    emb_relu = emb_relu.astype(jnp.bfloat16)

    return {"w_if": w_if, "b_if": b_if, "w_h": w_h, "b_h": b_h,
            "w_out": w_out, "b_out": b_out, "emb_relu": emb_relu,
            "H": H, "Hp": Hp, "E": E, "Ep": Ep, "V": V, "Vp": Vp, "tv": tv}


# ---------------------------------------------------------------------------
# Multi-step driver; T = 1 reproduces the module's forward exactly.
# ---------------------------------------------------------------------------
def decoder_rnn_steps(tokens, hidden, prep):
    """tokens: int32 (T, bs); hidden: (1, bs, H). Returns (logp (T,bs,V), h')."""
    T, bs = tokens.shape
    H, Hp, Ep, V, Vp, tv = (prep["H"], prep["Hp"], prep["Ep"],
                            prep["V"], prep["Vp"], prep["tv"])
    bsp = _round_up(bs, 8)
    TB = min(T, 8)                        # timesteps per recurrent grid step
    T_pad = _round_up(T, TB)
    Mp = T_pad * bsp                      # rows for the batched GEMMs
    tm = Mp if Mp <= 256 else 256
    Mp2 = _round_up(Mp, tm)
    nM, nV = Mp2 // tm, Vp // tv

    # --- embedding gather (relu already applied to the table) ---------------
    tokens_p = jnp.zeros((T_pad, bsp), jnp.int32).at[:T, :bs].set(tokens)
    x_emb = prep["emb_relu"][tokens_p.reshape(-1)]            # (Mp, Ep) bf16
    if Mp2 != Mp:
        x_emb = jnp.zeros((Mp2, Ep), jnp.bfloat16).at[:Mp].set(x_emb)

    # --- kernel 1: input-side projection, all timesteps in one big GEMM -----
    xin_flat = pl.pallas_call(
        _input_proj_kernel,
        grid=(nM,),
        out_shape=jax.ShapeDtypeStruct((Mp2, 3 * Hp), jnp.float32),
        in_specs=[
            pl.BlockSpec((tm, Ep), lambda i: (i, 0)),
            pl.BlockSpec((Ep, 3 * Hp), lambda i: (0, 0)),
            pl.BlockSpec((1, 3 * Hp), lambda i: (0, 0)),
        ],
        out_specs=pl.BlockSpec((tm, 3 * Hp), lambda i: (i, 0)),
        compiler_params=pltpu.CompilerParams(dimension_semantics=("parallel",)),
        cost_estimate=pl.CostEstimate(
            flops=2 * Mp2 * Ep * 3 * Hp, transcendentals=0,
            bytes_accessed=Mp2 * Ep * 2 + Ep * 3 * Hp * 2 + Mp2 * 3 * Hp * 4),
    )(x_emb, prep["w_if"], prep["b_if"])
    xin = xin_flat[:Mp].reshape(T_pad, bsp, 3 * Hp)

    # --- kernel 2: sequential GRU recurrence (hidden-side matmul only) ------
    h0 = _pad2d(hidden[0], bsp, Hp)                           # (bsp, Hp) f32
    h_seq = pl.pallas_call(
        _gru_steps_kernel,
        grid=(T_pad // TB,),
        out_shape=jax.ShapeDtypeStruct((T_pad, bsp, Hp), jnp.float32),
        in_specs=[
            pl.BlockSpec((TB, bsp, 3 * Hp), lambda t: (t, 0, 0)),
            # Constant index_maps: resident in VMEM for the whole sequence.
            # (pl.Buffered(1) would halve their double-buffered footprint, but
            #  the resident hidden-side weights are already small.)
            pl.BlockSpec((bsp, Hp), lambda t: (0, 0)),
            pl.BlockSpec((Hp, 3 * Hp), lambda t: (0, 0)),
            pl.BlockSpec((1, 3 * Hp), lambda t: (0, 0)),
        ],
        out_specs=pl.BlockSpec((TB, bsp, Hp), lambda t: (t, 0, 0)),
        scratch_shapes=[pltpu.VMEM((bsp, Hp), jnp.float32)],   # hidden carry
        compiler_params=pltpu.CompilerParams(dimension_semantics=("arbitrary",)),
        cost_estimate=pl.CostEstimate(
            flops=2 * T_pad * bsp * Hp * 3 * Hp,
            transcendentals=3 * T_pad * bsp * Hp,
            bytes_accessed=Mp * 3 * Hp * 4 + Hp * 3 * Hp * 2 + Mp * Hp * 4),
    )(xin, h0, prep["w_h"], prep["b_h"])

    # --- kernel 3: output projection + online LSE, tiled over V -------------
    h_flat = h_seq.reshape(Mp, Hp).astype(jnp.bfloat16)
    if Mp2 != Mp:
        h_flat = jnp.zeros((Mp2, Hp), jnp.bfloat16).at[:Mp].set(h_flat)
    logits, lse = pl.pallas_call(
        _output_proj_kernel,
        grid=(nM, nV),
        out_shape=(jax.ShapeDtypeStruct((Mp2, Vp), jnp.float32),
                   jax.ShapeDtypeStruct((Mp2, 1), jnp.float32)),
        in_specs=[
            pl.BlockSpec((tm, Hp), lambda i, j: (i, 0)),
            pl.BlockSpec((Hp, tv), lambda i, j: (0, j)),
            pl.BlockSpec((1, tv), lambda i, j: (0, j)),
        ],
        out_specs=(pl.BlockSpec((tm, tv), lambda i, j: (i, j)),
                   pl.BlockSpec((tm, 1), lambda i, j: (i, 0))),
        scratch_shapes=[pltpu.VMEM((tm, 1), jnp.float32),
                        pltpu.VMEM((tm, 1), jnp.float32)],
        compiler_params=pltpu.CompilerParams(
            dimension_semantics=("parallel", "arbitrary")),
        cost_estimate=pl.CostEstimate(
            flops=2 * Mp2 * Hp * Vp, transcendentals=Mp2 * Vp,
            bytes_accessed=Mp2 * Hp * 2 + Hp * Vp * 2 + Mp2 * Vp * 4),
    )(h_flat, prep["w_out"], prep["b_out"])

    # --- kernel 4: normalize: logp = logits - lse ----------------------------
    logp_pad = pl.pallas_call(
        _normalize_kernel,
        grid=(nM, nV),
        out_shape=jax.ShapeDtypeStruct((Mp2, Vp), jnp.float32),
        in_specs=[pl.BlockSpec((tm, tv), lambda i, j: (i, j)),
                  pl.BlockSpec((tm, 1), lambda i, j: (i, 0))],
        out_specs=pl.BlockSpec((tm, tv), lambda i, j: (i, j)),
        compiler_params=pltpu.CompilerParams(
            dimension_semantics=("parallel", "parallel")),
    )(logits, lse)

    logp = logp_pad[:Mp].reshape(T_pad, bsp, Vp)[:T, :bs, :V]
    h_new = h_seq[T - 1, :bs, :H][None]
    return logp, h_new


def decoder_rnn_forward(inputs, hidden, prep):
    """Single decode step, matching DecoderRNN.forward. inputs: int32 (bs,)."""
    logp_seq, h_new = decoder_rnn_steps(inputs[None, :], hidden, prep)
    return logp_seq[0], h_new


# ---------------------------------------------------------------------------
# Pure-JAX f32 reference (exact PyTorch semantics) for correctness checking.
# ---------------------------------------------------------------------------
def _reference_forward(inputs, hidden, params):
    H = params["w_hh"].shape[1]
    x = jnp.maximum(params["embedding"][inputs], 0.0)
    h = hidden[0]
    gi = x @ params["w_ih"].T + params["b_ih"]
    gh = h @ params["w_hh"].T + params["b_hh"]
    r = jax.nn.sigmoid(gi[:, :H] + gh[:, :H])
    z = jax.nn.sigmoid(gi[:, H:2 * H] + gh[:, H:2 * H])
    n = jnp.tanh(gi[:, 2 * H:] + r * gh[:, 2 * H:])
    h_new = (1.0 - z) * n + z * h
    logits = h_new @ params["w_out"].T + params["b_out"]
    return jax.nn.log_softmax(logits, axis=1), h_new[None]


def init_params(key, hidden_size, output_size, emb_dim=300):
    ks = jax.random.split(key, 8)
    s = 0.1
    return {
        "embedding": s * jax.random.normal(ks[0], (output_size, emb_dim), jnp.float32),
        "w_ih": s * jax.random.normal(ks[1], (3 * hidden_size, emb_dim), jnp.float32),
        "w_hh": s * jax.random.normal(ks[2], (3 * hidden_size, hidden_size), jnp.float32),
        "b_ih": s * jax.random.normal(ks[3], (3 * hidden_size,), jnp.float32),
        "b_hh": s * jax.random.normal(ks[4], (3 * hidden_size,), jnp.float32),
        "w_out": s * jax.random.normal(ks[5], (output_size, hidden_size), jnp.float32),
        "b_out": s * jax.random.normal(ks[6], (output_size,), jnp.float32),
    }


if __name__ == "__main__":
    # Small shapes consistent with the module: batch=8, hidden=32, vocab=16,
    # embedding dim fixed at 300 by the module.
    bs, hidden_size, output_size = 8, 32, 16

    key = jax.random.PRNGKey(0)
    kp, ki, kt = jax.random.split(key, 3)
    params = init_params(kp, hidden_size, output_size)
    prep = prepare_decoder_params(params, hidden_size, output_size)

    inputs = jax.random.randint(ki, (bs,), 0, output_size, dtype=jnp.int32)
    hidden = jnp.zeros((1, bs, hidden_size), jnp.float32)     # initHidden()

    # --- single step (module forward) ---
    logp, h_new = decoder_rnn_forward(inputs, hidden, prep)
    jax.block_until_ready((logp, h_new))

    assert logp.shape == (bs, output_size)
    assert h_new.shape == (1, bs, hidden_size)
    assert jnp.allclose(jnp.sum(jnp.exp(logp), axis=1), 1.0, atol=1e-4)

    ref_logp, ref_h = _reference_forward(inputs, hidden, params)
    assert jnp.allclose(logp, ref_logp, atol=2e-2), float(jnp.max(jnp.abs(logp - ref_logp)))
    assert jnp.allclose(h_new, ref_h, atol=2e-2)

    # --- multi-step (teacher-forced) path ---
    T = 4
    tokens = jax.random.randint(kt, (T, bs), 0, output_size, dtype=jnp.int32)
    logp_seq, h_T = decoder_rnn_steps(tokens, hidden, prep)
    jax.block_until_ready((logp_seq, h_T))

    h_ref = hidden
    for t in range(T):
        ref_lp, h_ref = _reference_forward(tokens[t], h_ref, params)
        assert jnp.allclose(logp_seq[t], ref_lp, atol=3e-2)
    assert jnp.allclose(h_T, h_ref, atol=3e-2)

    print("KERNEL_OK")
</pallas_src>

<mosaic_0001>
module attributes {stable_mosaic.version = 11 : i64} {
  func.func @_input_proj_kernel(%arg0: i32, %arg1: memref<8x384xbf16, #tpu.memory_space<vmem>>, %arg2: memref<384x384xbf16, #tpu.memory_space<vmem>>, %arg3: memref<1x384xf32, #tpu.memory_space<vmem>>, %arg4: memref<8x384xf32, #tpu.memory_space<vmem>>) attributes {dimension_semantics = [#tpu.dimension_semantics<parallel>], iteration_bounds = array<i64: 1>, scalar_prefetch = 0 : i64, scratch_operands = 0 : i64, tpu.core_type = #tpu.core_type<tc>, window_params = [{transform_indices = @transform_0, window_bounds = array<i64: 8, 384>}, {pipeline_mode = #tpu.pipeline_mode<synchronous>, transform_indices = @transform_1, window_bounds = array<i64: 384, 384>}, {pipeline_mode = #tpu.pipeline_mode<synchronous>, transform_indices = @transform_2, window_bounds = array<i64: 1, 384>}, {transform_indices = @transform_3, window_bounds = array<i64: 8, 384>}]} {
    %c0 = arith.constant 0 : index
    %c0_0 = arith.constant 0 : index
    %0 = vector.load %arg1[%c0, %c0_0] : memref<8x384xbf16, #tpu.memory_space<vmem>>, vector<8x384xbf16>
    %c0_1 = arith.constant 0 : index
    %c0_2 = arith.constant 0 : index
    %1 = vector.load %arg2[%c0_1, %c0_2] : memref<384x384xbf16, #tpu.memory_space<vmem>>, vector<384x384xbf16>
    %cst = arith.constant dense<0.000000e+00> : vector<8x384xf32>
    %2 = tpu.matmul %0, %1, %cst {dimension_numbers = #tpu.dot_dimension_numbers<[1], [0], [0], [1], [0, 0, 1, 1], [], []>} : vector<8x384xbf16>, vector<384x384xbf16>, vector<8x384xf32> -> vector<8x384xf32>
    %c0_3 = arith.constant 0 : index
    %c0_4 = arith.constant 0 : index
    %3 = vector.load %arg3[%c0_3, %c0_4] : memref<1x384xf32, #tpu.memory_space<vmem>>, vector<1x384xf32>
    %4 = vector.broadcast %3 : vector<1x384xf32> to vector<8x384xf32>
    %5 = arith.addf %2, %4 : vector<8x384xf32>
    %c0_5 = arith.constant 0 : index
    %c0_6 = arith.constant 0 : index
    %6 = vector.load %arg4[%c0_5, %c0_6] : memref<8x384xf32, #tpu.memory_space<vmem>>, vector<8x384xf32>
    tpu.vector_store %arg4[%c0_5, %c0_6], %5 {strides = array<i32>} : memref<8x384xf32, #tpu.memory_space<vmem>>, vector<8x384xf32>,
    return
  }
  func.func @transform_0(%arg0: i32) -> (i32, i32) {
    %c0_i32 = arith.constant 0 : i32
    %c0_i32_0 = arith.constant 0 : i32
    return %arg0, %c0_i32 : i32, i32
  }
  func.func @transform_1(%arg0: i32) -> (i32, i32) {
    %c0_i32 = arith.constant 0 : i32
    %c0_i32_0 = arith.constant 0 : i32
    %c0_i32_1 = arith.constant 0 : i32
    return %c0_i32, %c0_i32_0 : i32, i32
  }
  func.func @transform_2(%arg0: i32) -> (i32, i32) {
    %c0_i32 = arith.constant 0 : i32
    %c0_i32_0 = arith.constant 0 : i32
    %c0_i32_1 = arith.constant 0 : i32
    return %c0_i32, %c0_i32_0 : i32, i32
  }
  func.func @transform_3(%arg0: i32) -> (i32, i32) {
    %c0_i32 = arith.constant 0 : i32
    %c0_i32_0 = arith.constant 0 : i32
    return %arg0, %c0_i32 : i32, i32
  }
}

</mosaic_0001>

<bundles_post_ra>
// kernel: tpu_custom_call.1
= control target key start
LH: loop header
LB: loop body
LE: loop exit
PB: predicated region body
PF: predicated region fallthrough
CT: control target
= control target key end

     0   :  { %8 = vsyncpa [#allocation3], 0  ;;  %s1118_s0 = inlined_call_operand.hbm [shape: bf16[8,384], index: 0, kind: input, shape index: {}]   ;;  %s1119_s1 = inlined_call_operand.hbm [shape: bf16[384,384], index: 1, kind: input, shape index: {}]   ;;  %s1120_s2 = inlined_call_operand.vmem [shape: f32[1,384], index: 2, kind: input, shape index: {}]   ;;  %s1121_s3 = inlined_call_operand.hbm [shape: f32[8,384], index: 3, kind: output, shape index: {}]  }
   0x1   :  { %9 = vsyncpa [#allocation6], 0 }
   0x2   :  { %10 = vsyncpa [#allocation4], 0  ;;  %s1044_s12 = smov [#allocation2]   ;;  %s1045_s14 = smov [#allocation5]  }
   0x3   :  { %s17_s13 = sshll.u32 %s1044_s12, 4  ;;  %s26_s15 = sshll.u32 %s1045_s14, 4  ;;  %s18_s13 = int_to_ptr.vmem [resolvable:$true] %s17_s13  ;;  %s1072_s15 = int_to_ptr.vmem [resolvable:$true] %s26_s15 }
   0x4   :  { %s972_s18 = scalar_lea.hbm %s1118_s0, 192 }
   0x5   :  { %p973_p0 = scmp.ne.s32.totalorder %s1118_s0, %s972_s18  ;;  %p976_p1 = scmp.lt.u32.totalorder %s972_s18, %s1118_s0 }
   0x7   :  { %p978_p2 = pnand %p976_p1, %p973_p0 }
   0x9   :  { %981 = shalt.err (!%p978_p2)
}
   0xa   :  { %s982_s23 = scalar_lea.vmem %s18_s13, 192  ;;  %p987_p4 = scmp.lt.s32.totalorder %s18_s13, %s18_s13 }
   0xb   :  { %p983_p3 = scmp.ne.s32.totalorder %s18_s13, %s982_s23  ;;  %p988_p5 = scmp.lt.s32.totalorder %s982_s23, %s982_s23 }
   0xd   :  { %p989_p6 = por %p988_p5, %p987_p4 }
   0xf   :  { %p990_p7 = pnand %p989_p6, %p983_p3 }
  0x11   :  { %993 = shalt.err (!%p990_p7)
}
  0x12   :  { %20 = dma.hbm_to_vmem [thread:$0]  %s1118_s0, 192, %s18_s13, [#allocation3]  }
  0x13   :  { %s994_s28 = scalar_lea.hbm %s1119_s1, 9216 }
  0x14   :  { %p995_p8 = scmp.ne.s32.totalorder %s1119_s1, %s994_s28  ;;  %p998_p9 = scmp.lt.u32.totalorder %s994_s28, %s1119_s1 }
  0x16   :  { %p1000_p10 = pnand %p998_p9, %p995_p8 }
  0x18   :  { %1003 = shalt.err (!%p1000_p10)
}
  0x19   :  { %s1004_s6 = scalar_lea.vmem %s1072_s15, 9216  ;;  %p1009_p12 = scmp.lt.s32.totalorder %s1072_s15, %s1072_s15 }
  0x1a   :  { %p1005_p11 = scmp.ne.s32.totalorder %s1072_s15, %s1004_s6  ;;  %p1010_p13 = scmp.lt.s32.totalorder %s1004_s6, %s1004_s6 }
  0x1c   :  { %p1011_p0 = por %p1010_p13, %p1009_p12 }
  0x1e   :  { %p1012_p1 = pnand %p1011_p0, %p1005_p11 }
  0x20   :  { %1015 = shalt.err (!%p1012_p1)
}
  0x21   :  { %s1046_s0 = smov 192   ;;  %s1047_s7 = smov 12  }
  0x22   :  { %32 = dma.hbm_to_vmem [thread:$0]  %s1119_s1, 9216, %s1072_s15, [#allocation6], %s1046_s0, %s1046_s0, %s1047_s7  }
  0x23   :  { %1038 = dma.done.wait [#allocation3], 192  }
  0x24   :  { %1039 = vsyncadd [#allocation3], 4294967104 }
  0x25   :  { %1040 = dma.done.wait [#allocation6], 9216  }
  0x26   :  { %1041 = vsyncadd [#allocation6], 4294958080  ;;  %v873_v0 = vld [vmem:[#allocation5 + $0x4] ss:$12 sps:$4 sm:$0xff]   ;;  %v875_v1 = vld [vmem:[#allocation5] ss:$12 sps:$4 sm:$0xff]  }
  0x27   :  { %552 = vmatprep.subr.bf16.mxu0 %v873_v0  ;;  %v876_v2 = vld [vmem:[#allocation5 + $0x1c] ss:$12 sps:$4 sm:$0xff]   ;;  %v878_v3 = vld [vmem:[#allocation5 + $0x18] ss:$12 sps:$4 sm:$0xff]   ;;  %v881_v6 = vld [vmem:[#allocation5 + $0x34] ss:$12 sps:$4 sm:$0xff]  }
  0x28   :  { %553 = vmatpush1.bf16.msra.mxu0 %v875_v1  ;;  %v879_v4 = vld [vmem:[#allocation5 + $0xc8] ss:$12 sps:$4 sm:$0xff]   ;;  %v883_v7 = vld [vmem:[#allocation5 + $0x30] ss:$12 sps:$4 sm:$0xff]   ;;  %v884_v8 = vld [vmem:[#allocation5 + $0xe0] ss:$12 sps:$4 sm:$0xff]  }
  0x29   :  { %554 = vmatprep.subr.bf16.mxu0 %v876_v2  ;;  %v880_v5 = vld [vmem:[#allocation5 + $0x8] ss:$12 sps:$4 sm:$0xff]   ;;  %808 = vmatprep.subr.bf16.mxu1 %v879_v4  ;;  %v885_v9 = vld [vmem:[#allocation5 + $0x20] ss:$12 sps:$4 sm:$0xff]   ;;  %v889_v12 = vld [vmem:[#allocation5 + $0xf8] ss:$12 sps:$4 sm:$0xff]  }
  0x2a   :  { %809 = vmatpush3.bf16.msra.mxu1 %v880_v5  ;;  %v886_v10 = vld [vmem:[#allocation5 + $0x4c] ss:$12 sps:$4 sm:$0xff]   ;;  %v888_v11 = vld [vmem:[#allocation5 + $0x48] ss:$12 sps:$4 sm:$0xff]   ;;  %v891_v14 = vld [vmem:[#allocation5 + $0x64] ss:$12 sps:$4 sm:$0xff]  }
  0x2b   :  { %810 = vmatprep.subr.bf16.mxu1 %v884_v8  ;;  %v890_v13 = vld [vmem:[#allocation5 + $0x38] ss:$12 sps:$4 sm:$0xff]   ;;  %v894_v15 = vld [vmem:[#allocation5 + $0x110] ss:$12 sps:$4 sm:$0xff]   ;;  %v893_v17 = vld [vmem:[#allocation5 + $0x60] ss:$12 sps:$4 sm:$0xff]  }
  0x2c   :  { %555 = vmatpush1.bf16.msra.mxu0 %v878_v3  ;;  %v895_v16 = vld [vmem:[#allocation5 + $0x50] ss:$12 sps:$4 sm:$0xff]   ;;  %v899_v19 = vld [vmem:[#allocation5 + $0x128] ss:$12 sps:$4 sm:$0xff]   ;;  %v898_v20 = vld [vmem:[#allocation5 + $0x78] ss:$12 sps:$4 sm:$0xff]  }
  0x2d   :  { %556 = vmatprep.subr.bf16.mxu0 %v881_v6  ;;  %v896_v18 = vld [vmem:[#allocation5 + $0x7c] ss:$12 sps:$4 sm:$0xff]   ;;  %v901_v22 = vld [vmem:[#allocation5 + $0x94] ss:$12 sps:$4 sm:$0xff]   ;;  %v909_v26 = vld [vmem:[#allocation5 + $0x158] ss:$12 sps:$4 sm:$0xff]  }
  0x2e   :  { %811 = vmatpush3.bf16.msra.mxu1 %v885_v9  ;;  %v900_v21 = vld [vmem:[#allocation5 + $0x68] ss:$12 sps:$4 sm:$0xff]   ;;  %v904_v23 = vld [vmem:[#allocation5 + $0x140] ss:$12 sps:$4 sm:$0xff]   ;;  %v903_v24 = vld [vmem:[#allocation5 + $0x90] ss:$12 sps:$4 sm:$0xff]  }
  0x2f   :  { %812 = vmatprep.subr.bf16.mxu1 %v889_v12  ;;  %v905_v25 = vld [vmem:[#allocation5 + $0x80] ss:$12 sps:$4 sm:$0xff]   ;;  %v908_v28 = vld [vmem:[#allocation5 + $0xa8] ss:$12 sps:$4 sm:$0xff]   ;;  %v910_v29 = vld [vmem:[#allocation5 + $0x98] ss:$12 sps:$4 sm:$0xff]  }
  0x30   :  { %557 = vmatpush1.bf16.msra.mxu0 %v883_v7  ;;  %v906_v27 = vld [vmem:[#allocation5 + $0xac] ss:$12 sps:$4 sm:$0xff]   ;;  %v914_v30 = vld [vmem:[#allocation5 + $0x170] ss:$12 sps:$4 sm:$0xff]   ;;  %v921_v38 = vld [vmem:[#allocation5 + $0x188] ss:$12 sps:$4 sm:$0xff]  }
  0x31   :  { %558 = vmatprep.subr.bf16.mxu0 %v886_v10  ;;  %v911_v31 = vld [vmem:[#allocation5 + $0xc4] ss:$12 sps:$4 sm:$0xff]   ;;  %v42_v32 = vld [vmem:[#allocation2] sm:$0xff]  ;;  %v913_v35 = vld [vmem:[#allocation5 + $0xc0] ss:$12 sps:$4 sm:$0xff]   ;;  %v1048_v40 = vmov 0.0  }
  0x32   :  { %813 = vmatpush3.bf16.msra.mxu1 %v890_v13  ;;  %v915_v33 = vld [vmem:[#allocation5 + $0xb0] ss:$12 sps:$4 sm:$0xff]   ;;  %v734_v34 = vcombine.high %v42_v32, %v42_v32  ;;  %v733_v37 = vcombine.low %v42_v32, %v42_v32  ;;  %v918_v39 = vld [vmem:[#allocation5 + $0xd8] ss:$12 sps:$4 sm:$0xff]   ;;  %v922_v41 = vld [vmem:[#allocation5 + $0xf4] ss:$12 sps:$4 sm:$0xff]  }
  0x33   :  { %814 = vmatprep.subr.bf16.mxu1 %v894_v15  ;;  %v916_v36 = vld [vmem:[#allocation5 + $0xdc] ss:$12 sps:$4 sm:$0xff]   ;;  %v925_v42 = vld [vmem:[#allocation5 + $0x1a0] ss:$12 sps:$4 sm:$0xff]   ;;  %vm1049_vm0 = vmmov 0   ;;  %v1050_v1 = vmov 0  }
  0x34   :  { %559 = vmatpush1.bf16.msra.mxu0 %v888_v11  ;;  %666 = vmatprep.mubr.bf16.mxu1 %v734_v34  ;;  %v924_v43 = vld [vmem:[#allocation5 + $0xf0] ss:$12 sps:$4 sm:$0xff]   ;;  %v926_v44 = vld [vmem:[#allocation5 + $0x10c] ss:$12 sps:$4 sm:$0xff]   ;;  %v928_v46 = vld [vmem:[#allocation5 + $0x108] ss:$12 sps:$4 sm:$0xff]  }
  0x35   :  { %560 = vmatprep.subr.bf16.mxu0 %v891_v14  ;;  %584 = vmatprep.mubr.bf16.mxu0 %v734_v34  ;;  %v929_v45 = vld [vmem:[#allocation5 + $0x1b8] ss:$12 sps:$4 sm:$0xff]   ;;  %v933_v48 = vld [vmem:[#allocation5 + $0x1d0] ss:$12 sps:$4 sm:$0xff]   ;;  %v932_v49 = vld [vmem:[#allocation5 + $0x120] ss:$12 sps:$4 sm:$0xff]  }
  0x36   :  { %815 = vmatpush3.bf16.msra.mxu1 %v895_v16  ;;  %v930_v47 = vld [vmem:[#allocation5 + $0x124] ss:$12 sps:$4 sm:$0xff]   ;;  %v934_v50 = vld [vmem:[#allocation5 + $0x13c] ss:$12 sps:$4 sm:$0xff]   ;;  %v938_v53 = vld [vmem:[#allocation5 + $0x154] ss:$12 sps:$4 sm:$0xff]  }
  0x37   :  { %816 = vmatprep.subr.bf16.mxu1 %v899_v19  ;;  %v937_v51 = vld [vmem:[#allocation5 + $0x1e8] ss:$12 sps:$4 sm:$0xff]   ;;  %v936_v52 = vld [vmem:[#allocation5 + $0x138] ss:$12 sps:$4 sm:$0xff]   ;;  %v941_v54 = vld [vmem:[#allocation5 + $0x200] ss:$12 sps:$4 sm:$0xff]   ;;  %v142_v19 = vlaneseq }
  0x38   :  { %561 = vmatpush1.bf16.msra.mxu0 %v893_v17  ;;  %v940_v55 = vld [vmem:[#allocation5 + $0x150] ss:$12 sps:$4 sm:$0xff]   ;;  %v942_v56 = vld [vmem:[#allocation5 + $0x16c] ss:$12 sps:$4 sm:$0xff]   ;;  %v944_v58 = vld [vmem:[#allocation5 + $0x168] ss:$12 sps:$4 sm:$0xff]  }
  0x39   :  { %562 = vmatprep.subr.bf16.mxu0 %v896_v18  ;;  %v945_v57 = vld [vmem:[#allocation5 + $0x218] ss:$12 sps:$4 sm:$0xff]   ;;  %v949_v60 = vld [vmem:[#allocation5 + $0x230] ss:$12 sps:$4 sm:$0xff]   ;;  %v946_v61 = vld [vmem:[#allocation5 + $0x180] ss:$12 sps:$4 sm:$0xff]  }
  0x3a   :  { %817 = vmatpush3.bf16.msra.mxu1 %v900_v21  ;;  %v948_v59 = vld [vmem:[#allocation5 + $0x184] ss:$12 sps:$4 sm:$0xff]   ;;  %v952_v62 = vld [vmem:[#allocation5 + $0x19c] ss:$12 sps:$4 sm:$0xff]   ;;  %v956_v2 = vld [vmem:[#allocation5 + $0x1b4] ss:$12 sps:$4 sm:$0xff]  }
  0x3b   :  { %818 = vmatprep.subr.bf16.mxu1 %v904_v23  ;;  %v953_v63 = vld [vmem:[#allocation2 + $0x8] ss:$0 sps:$4 sm:$0xff]   ;;  %v950_v0 = vld [vmem:[#allocation5 + $0x198] ss:$12 sps:$4 sm:$0xff]   ;;  %v957_v5 = vld [vmem:[#allocation5 + $0x1c8] ss:$12 sps:$4 sm:$0xff]  }
  0x3c   :  { %563 = vmatpush1.bf16.msra.mxu0 %v898_v20  ;;  %v954_v3 = vld [vmem:[#allocation5 + $0x1b0] ss:$12 sps:$4 sm:$0xff]   ;;  %v959_v4 = vld [vmem:[#allocation5 + $0x1cc] ss:$12 sps:$4 sm:$0xff]   ;;  %v968_v10 = vld [vmem:[#allocation5 + $0x214] ss:$12 sps:$4 sm:$0xff]  }
  0x3d   :  { %564 = vmatprep.subr.bf16.mxu0 %v901_v22  ;;  %v962_v6 = vld [vmem:[#allocation5 + $0x1e4] ss:$12 sps:$4 sm:$0xff]   ;;  %v960_v7 = vld [vmem:[#allocation5 + $0x1e0] ss:$12 sps:$4 sm:$0xff]   ;;  %v965_v8 = vld [vmem:[#allocation5 + $0x1fc] ss:$12 sps:$4 sm:$0xff]  }
  0x3e   :  { %819 = vmatpush3.bf16.msra.mxu1 %v905_v25  ;;  %v963_v9 = vld [vmem:[#allocation5 + $0x1f8] ss:$12 sps:$4 sm:$0xff]   ;;  %v966_v11 = vld [vmem:[#allocation5 + $0x210] ss:$12 sps:$4 sm:$0xff]   ;;  %v969_v13 = vld [vmem:[#allocation5 + $0x228] ss:$12 sps:$4 sm:$0xff]  }
  0x3f   :  { %820 = vmatprep.subr.bf16.mxu1 %v909_v26  ;;  %v971_v12 = vld [vmem:[#allocation5 + $0x22c] ss:$12 sps:$4 sm:$0xff]   ;;  %v143_v20 = vshrl.u32 %v142_v19, 7  ;;  %v140_v22 = vld [vmem:[%s1120_s2] sm:$0x7]  ;;  %s1051_s11 = smov [#allocation7]  }
  0x40   :  { %565 = vmatpush1.bf16.msra.mxu0 %v903_v24  ;;  %s723_s12 = sshll.u32 %s1051_s11, 4  ;;  %s724_s12 = int_to_ptr.vmem [resolvable:$true] %s723_s12 }
  0x41   :  { %566 = vmatprep.subr.bf16.mxu0 %v906_v27  ;;  %v152_v21 = vsub.s32 2, %v143_v20  ;;  %s1016_s2 = scalar_lea.vmem %s724_s12, 384  ;;  %p1021_p3 = scmp.lt.s32.totalorder %s724_s12, %s724_s12 }
  0x42   :  { %821 = vmatpush3.bf16.msra.mxu1 %v910_v29  ;;  %p1017_p2 = scmp.ne.s32.totalorder %s724_s12, %s1016_s2  ;;  %p1022_p4 = scmp.lt.s32.totalorder %s1016_s2, %s1016_s2 }
  0x43   :  { %822 = vmatprep.subr.bf16.mxu1 %v914_v30  ;;  %v153_v23 = vrot.slane %v140_v22, %v152_v21  ;;  %v144_v30 = vsub.s32 0, %v143_v20 }
  0x44   :  { %567 = vmatpush1.bf16.msra.mxu0 %v908_v28  ;;  %p1023_p5 = por %p1022_p4, %p1021_p3 }
  0x45   :  { %568 = vmatprep.subr.bf16.mxu0 %v911_v31  ;;  %v148_v31 = vsub.s32 1, %v143_v20  ;;  %v145_v32 = vrot.slane %v140_v22, %v144_v30 }
  0x46   :  { %823 = vmatpush3.bf16.msra.mxu1 %v915_v33  ;;  %p1024_p6 = pnand %p1023_p5, %p1017_p2 }
  0x47   :  { %839 = vmatprep.subr.bf16.mxu1 %v1048_v40  ;;  %v149_v33 = vrot.slane %v140_v22, %v148_v31 }
  0x48   :  { %569 = vmatpush1.bf16.msra.mxu0 %v913_v35 }
  0x49   :  { %570 = vmatprep.subr.bf16.mxu0 %v916_v36  ;;  %667 = vmatmul.mubr.bf16.vlgmr.msra.gmra.mrb[0].mxu1 %v733_v37 }
  0x4a   :  { %840 = vmatpush3.bf16.msra.mxu1 %v921_v38  ;;  %855 = vmatprep.mubr.msk.bf16.mxu1 %vm1049_vm0, %v1048_v40 }
  0x4b   :  { %841 = vmatprep.subr.bf16.mxu1 %v1048_v40 }
  0x4c   :  { %571 = vmatpush1.bf16.msra.mxu0 %v918_v39 }
  0x4d   :  { %572 = vmatprep.subr.bf16.mxu0 %v922_v41 }
  0x4e   :  { %842 = vmatpush3.bf16.msra.mxu1 %v925_v42 }
  0x4f   :  { %843 = vmatprep.subr.bf16.mxu1 %v1048_v40 }
  0x50   :  { %573 = vmatpush1.bf16.msra.mxu0 %v924_v43 }
  0x51   :  { %574 = vmatprep.subr.bf16.mxu0 %v926_v44 }
  0x52   :  { %844 = vmatpush3.bf16.msra.mxu1 %v929_v45 }
  0x53   :  { %845 = vmatprep.subr.bf16.mxu1 %v1048_v40 }
  0x54   :  { %575 = vmatpush1.bf16.msra.mxu0 %v928_v46 }
  0x55   :  { %576 = vmatprep.subr.bf16.mxu0 %v930_v47 }
  0x56   :  { %846 = vmatpush3.bf16.msra.mxu1 %v933_v48 }
  0x57   :  { %847 = vmatprep.subr.bf16.mxu1 %v1048_v40 }
  0x58   :  { %577 = vmatpush1.bf16.msra.mxu0 %v932_v49 }
  0x59   :  { %578 = vmatprep.subr.bf16.mxu0 %v934_v50 }
  0x5a   :  { %848 = vmatpush3.bf16.msra.mxu1 %v937_v51 }
  0x5b   :  { %849 = vmatprep.subr.bf16.mxu1 %v1048_v40 }
  0x5c   :  { %579 = vmatpush1.bf16.msra.mxu0 %v936_v52 }
  0x5d   :  { %580 = vmatprep.subr.bf16.mxu0 %v938_v53 }
  0x5e   :  { %850 = vmatpush3.bf16.msra.mxu1 %v941_v54 }
  0x5f   :  { %851 = vmatprep.subr.bf16.mxu1 %v1048_v40 }
  0x60   :  { %581 = vmatpush1.bf16.msra.mxu0 %v940_v55 }
  0x61   :  { %582 = vmatprep.subr.bf16.mxu0 %v942_v56 }
  0x62   :  { %852 = vmatpush3.bf16.msra.mxu1 %v945_v57 }
  0x63   :  { %853 = vmatprep.subr.bf16.mxu1 %v1048_v40 }
  0x64   :  { %583 = vmatpush1.bf16.msra.mxu0 %v944_v58 }
  0x65   :  { %593 = vmatprep.subr.bf16.mxu0 %v948_v59 }
  0x66   :  { %854 = vmatpush3.bf16.msra.mxu1 %v949_v60 }
  0x67   :  { %585 = vmatmul.mubr.bf16.vlgmr.msra.gmra.mrb[0].mxu0 %v733_v37 }
  0x68   :  { %594 = vmatpush1.bf16.msra.mxu0 %v946_v61  ;;  %625 = vmatprep.mubr.bf16.mxu0 %v1050_v1 }
  0x69   :  { %595 = vmatprep.subr.bf16.mxu0 %v952_v62  ;;  %856 = vmatmul.mubr.bf16.vlgmr.msra.gmra.mrb[4].mxu1 %v953_v63 }
  0x6c   :  { %596 = vmatpush1.bf16.msra.mxu0 %v950_v0 }
  0x6d   :  { %597 = vmatprep.subr.bf16.mxu0 %v956_v2 }
  0x70   :  { %598 = vmatpush1.bf16.msra.mxu0 %v954_v3 }
  0x71   :  { %599 = vmatprep.subr.bf16.mxu0 %v959_v4 }
  0x74   :  { %600 = vmatpush1.bf16.msra.mxu0 %v957_v5 }
  0x75   :  { %601 = vmatprep.subr.bf16.mxu0 %v962_v6 }
  0x78   :  { %602 = vmatpush1.bf16.msra.mxu0 %v960_v7 }
  0x79   :  { %603 = vmatprep.subr.bf16.mxu0 %v965_v8 }
  0x7c   :  { %604 = vmatpush1.bf16.msra.mxu0 %v963_v9 }
  0x7d   :  { %605 = vmatprep.subr.bf16.mxu0 %v968_v10 }
  0x80   :  { %606 = vmatpush1.bf16.msra.mxu0 %v966_v11 }
  0x81   :  { %607 = vmatprep.subr.bf16.mxu0 %v971_v12 }
  0x84   :  { %608 = vmatpush1.bf16.msra.mxu0 %v969_v13 }
  0x87   :  { %626 = vmatmul.mubr.bf16.vlgmr.msra.gmra.mrb[0].mxu0 %v953_v63 }
 0x11c   :  { %v824_v14 = vpop.f32.mrb[0].mxu1 }
 0x11d   :  { %v825_v15 = vpop.f32.mrb[1].mxu1 }
 0x11e   :  { %v826_v16 = vadd.f32 %v825_v15, %v824_v14  ;;  %v827_v17 = vpop.f32.mrb[2].mxu1 }
 0x11f   :  { %v828_v18 = vpop.f32.mrb[3].mxu1 }
 0x120   :  { %v669_v24 = vadd.f32 %v826_v16, %v153_v23 }
 0x13c   :  { %v708_v25 = vpop.f32.mrb[4].mxu1 }
 0x13d   :  { %v709_v26 = vadd.f32 %v708_v25, %v669_v24  ;;  %v857_v27 = vpop.f32.mrb[5].mxu1 }
 0x13e   :  { %v711_v28 = vpop.f32.mrb[6].mxu1 }
 0x13f   :  { %716 = vst [vmem:[#allocation7 + $0x10] sm:$0xff] %v709_v26  ;;  %v858_v29 = vpop.f32.mrb[7].mxu1 }
 0x15a   :  { %v627_v34 = vpop.f32.mrb[0].mxu0 }
 0x15b   :  { %v859_v35 = vadd.f32 %v627_v34, %v145_v32  ;;  %v629_v36 = vpop.f32.mrb[1].mxu0 }
 0x15c   :  { %v860_v37 = vadd.f32 %v629_v36, %v149_v33  ;;  %v631_v38 = vpop.f32.mrb[2].mxu0 }
 0x15d   :  { %714 = vst [vmem:[#allocation7] sm:$0xff] %v859_v35  ;;  %v632_v39 = vpop.f32.mrb[3].mxu0 }
 0x15e   :  { %715 = vst [vmem:[#allocation7 + $0x8] sm:$0xff] %v860_v37 }
 0x15f   :  { %1027 = shalt.err (!%p1024_p6)
}
 0x160   :  { %s1028_s15 = scalar_lea.hbm %s1121_s3, 384 }
 0x161   :  { %p1029_p7 = scmp.ne.s32.totalorder %s1121_s3, %s1028_s15  ;;  %p1032_p8 = scmp.lt.u32.totalorder %s1028_s15, %s1121_s3 }
 0x163   :  { %p1034_p9 = pnand %p1032_p8, %p1029_p7 }
 0x165   :  { %1037 = shalt.err (!%p1034_p9)
}
 0x166   :  { %726 = dma.vmem_to_hbm [thread:$0]  %s724_s12, 384, %s1121_s3, [#allocation4]  }
 0x167   :  { %1042 = dma.done.wait [#allocation4], 384  }
 0x168   :  { %1043 = vsyncadd [#allocation4], 4294966912 }
 0x169   :  { %730 = vsyncpa [#allocation3], 1 }
 0x16a   :  { %731 = vsyncpa [#allocation6], 1 }
 0x16b   :  { %732 = vsyncpa [#allocation4], 1 }

</bundles_post_ra>
